<compile_context>
chip_gen: v5e
topology: v5e:2x2
jax: 0.10.0
libtpu: 0.0.40
codegen_flags: <defaults>
</compile_context>

<pallas_src>
import jax
import jax.numpy as jnp
from jax import lax
from jax.experimental import pallas as pl
from jax.experimental.pallas import tpu as pltpu


def _transition_kernel(x_ref, sb_ref, w_ref, o_ref):
    """Fused BN(eval) -> ReLU -> AvgPool2d((2,1)) -> 1x1 conv for one NHWC tile.

    x_ref : (1, 2*TH2, W, C_in)  input rows (H pairs local to this tile)
    sb_ref: (2, 1, C_in)         row0 = 0.5*bn_scale, row1 = 0.5*bn_shift
    w_ref : (C_in, C_out)        1x1-conv weight, transposed
    o_ref : (1, TH2, W, C_out)
    """
    nh2 = o_ref.shape[1]
    scale = sb_ref[0]            # (1, C_in), elementwise compute dtype
    shift = sb_ref[1]            # (1, C_in)

    def body(k, carry):
        # Two H rows of one pool window; dynamic index is on a major (untiled)
        # ref dim, so this is pure address arithmetic (no relayout).
        xk = x_ref[0, pl.ds(2 * k, 2)].astype(scale.dtype)      # (2, W, C_in)
        # BN + ReLU.  The 0.5 avg-pool factor is pre-folded into scale/shift,
        # so the plain sum below is exactly the (2, 1) average pool.
        y = jnp.maximum(xk * scale + shift, 0.0)
        h = y[0] + y[1]                                         # (W, C_in)
        # 1x1 conv == channel matmul on the MXU, f32 accumulation.
        o_ref[0, k] = jnp.dot(h.astype(w_ref.dtype), w_ref[...],
                              preferred_element_type=jnp.float32
                              ).astype(o_ref.dtype)
        return carry

    lax.fori_loop(0, nh2, body, 0)


def transition_forward_nhwc(x, gamma, beta, running_mean, running_var, conv_w,
                            *, eps=1e-5, out_dtype=None,
                            mxu_dtype=jnp.bfloat16, elementwise_dtype=None,
                            tile_h2=None, vmem_budget_bytes=24 * 1024 * 1024):
    """Channels-last fast path: x (N, H, W, C_in) -> (N, H//2, W, C_out).

    Zero layout copies around the pallas_call: input is read as-is, output is
    written as-is.  Use this entry point when the network is kept NHWC.
    """
    N, H, W, C_in = x.shape
    if H < 2:
        raise ValueError("AvgPool2d((2,1)) needs H >= 2")
    H2 = H // 2
    if H % 2:                                   # AvgPool2d floors: drop last row
        x = x[:, :2 * H2]

    conv_w = conv_w.reshape(conv_w.shape[0], -1)        # (C_out, C_in)
    C_out = conv_w.shape[0]
    assert conv_w.shape[1] == C_in, (conv_w.shape, C_in)

    ew_dtype = jnp.dtype(elementwise_dtype) if elementwise_dtype is not None \
        else x.dtype
    out_dtype = jnp.dtype(out_dtype) if out_dtype is not None else x.dtype

    # TODO(synk): BatchNorm2d is implemented in inference (running-stats) form;
    # training-mode batch statistics / running-stat updates are not computed.
    # Fold BN running stats + the 0.5 avg-pool factor into scale/shift (f32),
    # then cast once to the elementwise compute dtype.
    s = gamma.astype(jnp.float32) * lax.rsqrt(running_var.astype(jnp.float32) + eps)
    b = beta.astype(jnp.float32) - running_mean.astype(jnp.float32) * s
    sb = jnp.stack([0.5 * s, 0.5 * b], axis=0).reshape(2, 1, C_in).astype(ew_dtype)

    w_mat = jnp.transpose(conv_w, (1, 0)).astype(mxu_dtype)      # (C_in, C_out)

    # ---- tile selection from a VMEM budget (fits v7x's 32 MiB scoped default).
    x_isz = x.dtype.itemsize
    o_isz = jnp.dtype(out_dtype).itemsize
    w_bytes = 2 * C_in * C_out * jnp.dtype(mxu_dtype).itemsize   # (<=2 buffers;
    # constant index_map means the weight is DMA'd only once, the second buffer
    # is just accounted for in the budget.)
    bytes_per_h2 = W * (2 * C_in * x_isz + C_out * o_isz)        # per pooled row
    if tile_h2 is None:
        budget = max(int(vmem_budget_bytes) - w_bytes, 2 * bytes_per_h2)
        tile_h2 = budget // (2 * bytes_per_h2)                   # double-buffered
        if N == 1 and H2 >= 2:
            # v7x has 2 TensorCores: keep >= 2 grid steps so the parallel grid
            # axes can shard across both cores.
            tile_h2 = min(tile_h2, pl.cdiv(H2, 2))
    tile_h2 = int(max(1, min(int(tile_h2), H2)))
    grid = (N, pl.cdiv(H2, tile_h2))

    est_vmem = (2 * (2 * tile_h2 * W * C_in * x_isz)     # double-buffered x tile
                + 2 * (tile_h2 * W * C_out * o_isz)      # double-buffered out tile
                + w_bytes + 4 * C_in * 4)
    vmem_limit = int(min(128 * 1024 * 1024,
                         max(32 * 1024 * 1024, est_vmem + 4 * 1024 * 1024)))

    # Last grid step along H2 may overhang: out-of-bounds input rows are
    # garbage and the corresponding output rows are discarded on writeback,
    # which is safe because rows are fully independent (see header note).
    return pl.pallas_call(
        _transition_kernel,
        out_shape=jax.ShapeDtypeStruct((N, H2, W, C_out), out_dtype),
        grid_spec=pltpu.PrefetchScalarGridSpec(
            num_scalar_prefetch=0,
            grid=grid,
            in_specs=[
                pl.BlockSpec((1, 2 * tile_h2, W, C_in),
                             lambda n, i: (n, i, 0, 0)),          # NHWC rows
                pl.BlockSpec((2, 1, C_in), lambda n, i: (0, 0, 0)),  # scale/shift
                pl.BlockSpec((C_in, C_out), lambda n, i: (0, 0)),    # conv weight
            ],
            out_specs=pl.BlockSpec((1, tile_h2, W, C_out),
                                   lambda n, i: (n, i, 0, 0)),
        ),
        compiler_params=pltpu.CompilerParams(
            dimension_semantics=("parallel", "parallel"),
            vmem_limit_bytes=vmem_limit),
    )(x, sb, w_mat)


def transition_forward(x_nchw, gamma, beta, running_mean, running_var, conv_w,
                       *, eps=1e-5, out_dtype=None, mxu_dtype=jnp.bfloat16,
                       elementwise_dtype=None, tile_h2=None):
    """PyTorch drop-in: NCHW in -> NCHW out, same semantics as `_Transition`.

    NOTE: the two transposes below are full HBM passes kept only for NCHW
    compatibility.  In a channels-last pipeline call `transition_forward_nhwc`
    directly and skip both (that path adds zero HBM copies around the kernel).
    """
    x_nhwc = jnp.transpose(x_nchw, (0, 2, 3, 1))
    y = transition_forward_nhwc(x_nhwc, gamma, beta, running_mean, running_var,
                                conv_w, eps=eps, out_dtype=out_dtype,
                                mxu_dtype=mxu_dtype,
                                elementwise_dtype=elementwise_dtype,
                                tile_h2=tile_h2)
    return jnp.transpose(y, (0, 3, 1, 2))


def _reference(x_nchw, gamma, beta, run_mean, run_var, conv_w, eps=1e-5):
    # Pure-JAX reference of the PyTorch forward (BN eval mode).
    inv = 1.0 / jnp.sqrt(run_var + eps)
    xn = (x_nchw - run_mean[None, :, None, None]) * inv[None, :, None, None]
    xn = xn * gamma[None, :, None, None] + beta[None, :, None, None]
    xn = jnp.maximum(xn, 0.0)
    y = jnp.einsum('nchw,oc->nohw', xn, conv_w,
                   precision=lax.Precision.HIGHEST)
    n, c_out, h, w = y.shape
    return y.reshape(n, c_out, h // 2, 2, w).mean(axis=3)


if __name__ == "__main__":
    key = jax.random.PRNGKey(0)
    N, C_in, H, W = 2, 16, 16, 16          # small NCHW input
    C_out = 32                              # num_output_features

    ks = jax.random.split(key, 6)
    x = jax.random.normal(ks[0], (N, C_in, H, W), dtype=jnp.float32)
    gamma = 1.0 + 0.1 * jax.random.normal(ks[1], (C_in,), dtype=jnp.float32)
    beta = 0.1 * jax.random.normal(ks[2], (C_in,), dtype=jnp.float32)
    run_mean = 0.1 * jax.random.normal(ks[3], (C_in,), dtype=jnp.float32)
    run_var = jnp.abs(jax.random.normal(ks[4], (C_in,), dtype=jnp.float32)) + 0.5
    conv_w = jax.random.normal(ks[5], (C_out, C_in), dtype=jnp.float32) * 0.1

    ref = _reference(x, gamma, beta, run_mean, run_var, conv_w)

    # 1) Exact f32 path through the NCHW drop-in wrapper (module semantics).
    out_f32 = transition_forward(x, gamma, beta, run_mean, run_var, conv_w,
                                 mxu_dtype=jnp.float32)
    out_f32 = jax.block_until_ready(out_f32)
    assert out_f32.shape == (N, C_out, H // 2, W), out_f32.shape
    err = float(jnp.max(jnp.abs(out_f32 - ref)))
    assert err < 1e-3, f"f32 mismatch, max abs err {err}"

    # 2) Default path: f32 activations (f32 BN math), bf16 weights on the MXU.
    out_mix = transition_forward(x, gamma, beta, run_mean, run_var, conv_w)
    out_mix = jax.block_until_ready(out_mix)
    err = float(jnp.max(jnp.abs(out_mix - ref)))
    assert err < 5e-2, f"mixed-precision mismatch, max abs err {err}"

    # 3) Channels-last bf16 pipeline fast path (v6e/v7x): zero layout copies
    #    around the kernel, bf16 in / bf16 out, bf16 VPU elementwise.
    x_nhwc_bf16 = jnp.transpose(x, (0, 2, 3, 1)).astype(jnp.bfloat16)
    out_nhwc = transition_forward_nhwc(x_nhwc_bf16, gamma, beta, run_mean,
                                       run_var, conv_w)
    out_nhwc = jax.block_until_ready(out_nhwc)
    assert out_nhwc.shape == (N, H // 2, W, C_out), out_nhwc.shape
    ref_nhwc = jnp.transpose(ref, (0, 2, 3, 1))
    err = float(jnp.max(jnp.abs(out_nhwc.astype(jnp.float32) - ref_nhwc)))
    assert err < 0.15, f"bf16 NHWC mismatch, max abs err {err}"

    print("KERNEL_OK")
</pallas_src>

<mosaic_0001>
module attributes {stable_mosaic.version = 11 : i64} {
  func.func @_transition_kernel(%arg0: i32, %arg1: i32, %arg2: memref<1x16x16x16xf32, #tpu.memory_space<vmem>>, %arg3: memref<2x1x16xf32, #tpu.memory_space<vmem>>, %arg4: memref<16x32xf32, #tpu.memory_space<vmem>>, %arg5: memref<1x8x16x32xf32, #tpu.memory_space<vmem>>) attributes {dimension_semantics = [#tpu.dimension_semantics<parallel>, #tpu.dimension_semantics<parallel>], iteration_bounds = array<i64: 2, 1>, scalar_prefetch = 0 : i64, scratch_operands = 0 : i64, tpu.core_type = #tpu.core_type<tc>, window_params = [{transform_indices = @transform_0, window_bounds = array<i64: 1, 16, 16, 16>}, {pipeline_mode = #tpu.pipeline_mode<synchronous>, transform_indices = @transform_1, window_bounds = array<i64: 2, 1, 16>}, {pipeline_mode = #tpu.pipeline_mode<synchronous>, transform_indices = @transform_2, window_bounds = array<i64: 16, 32>}, {transform_indices = @transform_3, window_bounds = array<i64: 1, 8, 16, 32>}]} {
    %c0 = arith.constant 0 : index
    %c0_0 = arith.constant 0 : index
    %c0_1 = arith.constant 0 : index
    %0 = vector.load %arg3[%c0, %c0_0, %c0_1] : memref<2x1x16xf32, #tpu.memory_space<vmem>>, vector<1x1x16xf32>
    %1 = vector.shape_cast %0 : vector<1x1x16xf32> to vector<1x16xf32>
    %c1 = arith.constant 1 : index
    %c0_2 = arith.constant 0 : index
    %c0_3 = arith.constant 0 : index
    %2 = vector.load %arg3[%c1, %c0_2, %c0_3] : memref<2x1x16xf32, #tpu.memory_space<vmem>>, vector<1x1x16xf32>
    %3 = vector.shape_cast %2 : vector<1x1x16xf32> to vector<1x16xf32>
    %c0_i32 = arith.constant 0 : i32
    %c8_i32 = arith.constant 8 : i32
    %4 = arith.addi %c0_i32, %c8_i32 : i32
    %c1_i32 = arith.constant 1 : i32
    scf.for %arg6 = %c0_i32 to %4 step %c1_i32  : i32 {
      %c2_i32 = arith.constant 2 : i32
      %5 = arith.muli %c2_i32, %arg6 : i32
      %c0_5 = arith.constant 0 : index
      %6 = arith.index_cast %5 : i32 to index
      %c0_6 = arith.constant 0 : index
      %c0_7 = arith.constant 0 : index
      %7 = vector.load %arg2[%c0_5, %6, %c0_6, %c0_7] : memref<1x16x16x16xf32, #tpu.memory_space<vmem>>, vector<1x2x16x16xf32>
      %8 = vector.shape_cast %7 : vector<1x2x16x16xf32> to vector<2x16x16xf32>
      %9 = vector.shape_cast %1 : vector<1x16xf32> to vector<1x1x16xf32>
      %10 = vector.broadcast %9 : vector<1x1x16xf32> to vector<2x16x16xf32>
      %11 = arith.mulf %8, %10 : vector<2x16x16xf32>
      %12 = vector.shape_cast %3 : vector<1x16xf32> to vector<1x1x16xf32>
      %13 = vector.broadcast %12 : vector<1x1x16xf32> to vector<2x16x16xf32>
      %14 = arith.addf %11, %13 : vector<2x16x16xf32>
      %cst = arith.constant 0.000000e+00 : f32
      %15 = vector.broadcast %cst : f32 to vector<2x16x16xf32>
      %16 = arith.maximumf %14, %15 : vector<2x16x16xf32>
      %17 = vector.extract_strided_slice %16 {offsets = [0, 0, 0], sizes = [1, 16, 16], strides = [1, 1, 1]} : vector<2x16x16xf32> to vector<1x16x16xf32>
      %18 = vector.shape_cast %17 : vector<1x16x16xf32> to vector<16x16xf32>
      %19 = vector.extract_strided_slice %16 {offsets = [1, 0, 0], sizes = [1, 16, 16], strides = [1, 1, 1]} : vector<2x16x16xf32> to vector<1x16x16xf32>
      %20 = vector.shape_cast %19 : vector<1x16x16xf32> to vector<16x16xf32>
      %21 = arith.addf %18, %20 : vector<16x16xf32>
      %c0_8 = arith.constant 0 : index
      %c0_9 = arith.constant 0 : index
      %22 = vector.load %arg4[%c0_8, %c0_9] : memref<16x32xf32, #tpu.memory_space<vmem>>, vector<16x32xf32>
      %cst_10 = arith.constant dense<0.000000e+00> : vector<16x32xf32>
      %23 = tpu.matmul %21, %22, %cst_10 {dimension_numbers = #tpu.dot_dimension_numbers<[1], [0], [0], [1], [0, 0, 1, 1], [], []>} : vector<16x16xf32>, vector<16x32xf32>, vector<16x32xf32> -> vector<16x32xf32>
      %c0_11 = arith.constant 0 : index
      %24 = arith.index_cast %arg6 : i32 to index
      %c0_12 = arith.constant 0 : index
      %c0_13 = arith.constant 0 : index
      %25 = vector.load %arg5[%c0_11, %24, %c0_12, %c0_13] : memref<1x8x16x32xf32, #tpu.memory_space<vmem>>, vector<1x1x16x32xf32>
      %26 = vector.shape_cast %25 : vector<1x1x16x32xf32> to vector<16x32xf32>
      %27 = vector.shape_cast %23 : vector<16x32xf32> to vector<1x1x16x32xf32>
      tpu.vector_store %arg5[%c0_11, %24, %c0_12, %c0_13], %27 {strides = array<i32>} : memref<1x8x16x32xf32, #tpu.memory_space<vmem>>, vector<1x1x16x32xf32>,
    }
    %c8_i32_4 = arith.constant 8 : i32
    return
  }
  func.func @transform_0(%arg0: i32, %arg1: i32) -> (i32, i32, i32, i32) {
    %c0_i32 = arith.constant 0 : i32
    %c0_i32_0 = arith.constant 0 : i32
    %c0_i32_1 = arith.constant 0 : i32
    return %arg0, %arg1, %c0_i32, %c0_i32_0 : i32, i32, i32, i32
  }
  func.func @transform_1(%arg0: i32, %arg1: i32) -> (i32, i32, i32) {
    %c0_i32 = arith.constant 0 : i32
    %c0_i32_0 = arith.constant 0 : i32
    %c0_i32_1 = arith.constant 0 : i32
    %c0_i32_2 = arith.constant 0 : i32
    return %c0_i32, %c0_i32_0, %c0_i32_1 : i32, i32, i32
  }
  func.func @transform_2(%arg0: i32, %arg1: i32) -> (i32, i32) {
    %c0_i32 = arith.constant 0 : i32
    %c0_i32_0 = arith.constant 0 : i32
    %c0_i32_1 = arith.constant 0 : i32
    return %c0_i32, %c0_i32_0 : i32, i32
  }
  func.func @transform_3(%arg0: i32, %arg1: i32) -> (i32, i32, i32, i32) {
    %c0_i32 = arith.constant 0 : i32
    %c0_i32_0 = arith.constant 0 : i32
    %c0_i32_1 = arith.constant 0 : i32
    return %arg0, %arg1, %c0_i32, %c0_i32_0 : i32, i32, i32, i32
  }
}

</mosaic_0001>

<bundles_post_ra>
// kernel: tpu_custom_call.1
= control target key start
LH: loop header
LB: loop body
LE: loop exit
PB: predicated region body
PF: predicated region fallthrough
CT: control target
= control target key end

     0   :  { %8 = vsyncpa [#allocation3], 0  ;;  %s962_s0 = inlined_call_operand.hbm [shape: f32[2,16,16,16], index: 0, kind: input, shape index: {}]   ;;  %s963_s1 = inlined_call_operand.hbm [shape: f32[2,1,16], index: 1, kind: input, shape index: {}]   ;;  %s964_s2 = inlined_call_operand.hbm [shape: f32[16,32], index: 2, kind: input, shape index: {}]   ;;  %s965_s3 = inlined_call_operand.hbm [shape: f32[2,8,16,32], index: 3, kind: output, shape index: {}]  }
   0x1   :  { %10 = vsyncpa [#allocation3 + $0x1], 0 }
   0x2   :  { %11 = vsyncpa [#allocation6], 0 }
   0x3   :  { %12 = vsyncpa [#allocation4], 0 }
   0x4   :  { %14 = vsyncpa [#allocation4 + $0x1], 0  ;;  %s792_s12 = smov 0   ;;  %s794_s13 = smov 0  }
   0x5   :  { %s796_s14 = smov 0   ;;  %s798_s15 = smov 0  }
   0x6   :  { %s800_s16 = smov 0   ;;  %s802_s17 = smov 0  }
   0x7 LB: > { %s452_s18 = sadd.s32 4294967295, %s758_s17   ;;  %s453_s19 = sadd.s32 4294967294, %s758_s17   ;;  %s758_s17 = sphi %s802_s17, %s20_s17   ;;  %s754_s16 = sphi %s800_s16, %s975_s16   ;;  %s750_s15 = sphi %s798_s15, %s974_s15   ;;  %s746_s14 = sphi %s796_s14, %s973_s14   ;;  %s742_s13 = sphi %s794_s13, %s972_s13   ;;  %s738_s12 = sphi %s792_s12, %s971_s12  }
   0x8   : > { %p54_p0 = scmp.ne.s32.totalorder %s742_s13, %s738_s12  ;;  %p828_p1 = scmp.eq.s32.totalorder %s452_s18, 0 }
   0x9   : > { %p128_p2 = scmp.eq.s32.totalorder %s453_s19, 1  ;;  %p454_p4 = scmp.ge.s32.totalorder %s758_s17, 1 }
   0xa   : > { %p834_p3 = por %p828_p1, %p54_p0  ;;  %p135_p6 = scmp.lt.s32.totalorder %s758_s17, 3 }
   0xb   : > { %p839_p5 = por %p128_p2, %p54_p0  ;;  %s146_s25 = sshll.u32 %s963_s1, 4  ;;  %s147_s25 = int_to_ptr.hbm [resolvable:$true] %s146_s25 }
   0xc   : > { %p847_p7 = pnand %p454_p4, %p135_p6  ;;  %s764_s27 = smov [#allocation5]  }
   0xd   : > { %s148_s28 = sshll.u32 %s764_s27, 4  ;;  %p457_p10 = scmp.ge.s32.totalorder %s758_s17, 2  ;;  %s149_s28 = int_to_ptr.vmem [resolvable:$true] %s148_s28 }
   0xe   : > { %p493_p8 = pneg %p847_p7  ;;  %s160_s4 = sshll.u32 %s964_s2, 4  ;;  %s161_s4 = int_to_ptr.hbm [resolvable:$true] %s160_s4 }
   0xf   : > { %s765_s5 = smov 16   ;;  %s766_s6 = smov 1  }
  0x10   : > { %p494_p9 = pnand %p493_p8, %p828_p1  ;;  %s767_s7 = smov [#allocation7]  }
  0x11   : > { %s162_s8 = sshll.u32 %s767_s7, 4  ;;  %s768_s9 = smov 128   ;;  %s163_s8 = int_to_ptr.vmem [resolvable:$true] %s162_s8 }
  0x12   : > { %496 = dma.hbm_to_vmem [thread:$0]  (!%p494_p9), %s147_s25, 32, %s149_s28, [#allocation6], %s765_s5, %s765_s5, %s766_s6  }
  0x13   : > { %s769_s10 = smov 8   ;;  %p122_p11 = scmp.eq.s32.totalorder %s452_s18, 1 }
  0x14   : > { %499 = dma.hbm_to_vmem [thread:$0]  (!%p494_p9), %s161_s4, 256, %s163_s8, [#allocation6], %s768_s9, %s768_s9, %s769_s10  }
  0x15   : > { %s32_s11 = sadd.s32 1, %s754_s16  ;;  %s41_s19 = sadd.s32 1, %s746_s14 }
  0x16   : > { %p34_p12 = scmp.ge.s32.totalorder %s32_s11, 2  ;;  %p48_p13 = scmp.ne.s32.totalorder %s746_s14, %s742_s13 }
  0x17   : > { %p49_p0 = scmp.eq.s32.totalorder %s758_s17, 0  ;;  %p510_p4 = scmp.lt.s32.totalorder %s758_s17, 2 }
  0x18   : > { %s977_s11 = smov (%p34_p12, %s32_s11), 0  ;;  %p871_p2 = por %p122_p11, %p48_p13 }
  0x19   : > { %s36_s24 = ssub.s32 %s754_s16, %s977_s11  ;;  %s176_s25 = sand.u32 1, %s746_s14  }
  0x1a   : > { %p39_p6 = scmp.eq.s32.totalorder %s36_s24, 0  ;;  %p50_p8 = por %p49_p0, %p48_p13 }
  0x1b   : > { %s458_s27 = sshll.u32 %s176_s25, 8  ;;  %s476_s18 = sshll.u32 %s754_s16, 8 }
  0x1c   : > { %s881_s28 = scalar_select %p39_p6, %s746_s14, %s41_s19  }
  0x1d   : > { %s188_s4 = scalar_lea.hbm %s962_s0, %s476_s18  ;;  %s180_s6 = scalar_lea.vmem [#allocation2], %s458_s27 }
  0x1e   : > { %s189_s5 = sshll.u32 %s188_s4, 4  ;;  %s191_s7 = sshll.u32 %s180_s6, 4  ;;  %s190_s5 = int_to_ptr.hbm [resolvable:$true] %s189_s5  ;;  %s192_s7 = int_to_ptr.vmem [resolvable:$true] %s191_s7 }
  0x1f   : > { %p501_p9 = pnand %p510_p4, %p50_p8  ;;  %s177_s8 = scalar_lea.sflag [#allocation3], %s176_s25 }
  0x20   : > { %203 = sbr.rel (%p847_p7) target bundleno = 184 (0xb8), region = 32  ;;  %s894_s19 = sand.u32 (!%p847_p7), 1, %s742_s13  }
  0x21   : > { %503 = dma.hbm_to_vmem [thread:$0]  (!%p501_p9), %s190_s5, 4096, %s192_s7, %s177_s8, %s768_s9, %s768_s9, %s769_s10  }
  0x22   : > { %s462_s24 = sshll.u32 (!%p847_p7), %s894_s19, 8  ;;  %s206_s27 = scalar_lea.sflag (!%p847_p7), [#allocation3], %s894_s19 }
  0x23   : > { %s898_s18 = scalar_lea.vmem (!%p847_p7), [#allocation2], %s462_s24 }
  0x25   : > { %725 = dma.done.wait (%p834_p3), %s206_s27, 4096  }
  0x26   : > { %727 = vsyncadd (%p834_p3), %s206_s27, 4294963200 }
  0x27   : > { %729 = dma.done.wait (%p828_p1), [#allocation6], 288  }
  0x28   : > { %731 = vsyncadd (%p828_p1), [#allocation6], 4294967008  ;;  %s465_s26 = sshll.u32 %s894_s19, 7  ;;  %v245_v0 = vld [vmem:[#allocation5] sm:$0x1]  ;;  %s911_s10 = smov 0  }
  0x29   : > { %v247_v1 = vld [vmem:[#allocation5 + $0x1] sm:$0x1]  ;;  %s909_s9 = scalar_lea.vmem [#allocation8], %s465_s26 }
  0x2a LB: >> { %v282_v2 = vld [vmem:[#allocation7 + $0x8] sm:$0xff]  ;;  %v281_v3 = vld [vmem:[#allocation7] sm:$0xff]  ;;  %v262_v4 = vperm.slane %v245_v0, 0  ;;  %s477_s20 = sshll.u32 %s762_s10, 5  ;;  %v269_v5 = vperm.slane %v247_v1, 0  ;;  %vm283_vm0 = vcmask 130048   ;;  %s762_s10 = sphi %s911_s10, %s253_s10  }
  0x2b   : >> { %304 = vmatpush.msra.mxu0 %v282_v2  ;;  %479 = vmatpush.msra.mxu1 %v282_v2  ;;  %s256_s21 = scalar_lea.vmem %s898_s18, %s477_s20 [#allocation2]  ;;  %s470_s25 = sshll.u32 %s762_s10, 4  ;;  %vm315_vm1 = vcmask 261120  }
  0x2c   : >> { %v257_v6 = vld [vmem:[%s256_s21] sm:$0xff]  ;;  %v259_v7 = vld [vmem:[%s256_s21 + $0x10] sm:$0xff]  ;;  %v258_v8 = vld [vmem:[%s256_s21 + $0x8] sm:$0xff]  ;;  %s314_s29 = scalar_lea.vmem %s909_s9, %s470_s25 [#allocation8]  ;;  %s253_s10 = sadd.s32 1, %s762_s10  }
  0x2d   : >> { %305 = vmatpush.msra.mxu0 %v281_v3  ;;  %480 = vmatpush.msra.mxu1 %v281_v3  ;;  %v264_v9 = vmul.f32 %v262_v4, %v257_v6  ;;  %v266_v10 = vmul.f32 %v262_v4, %v259_v7  ;;  %v260_v11 = vld [vmem:[%s256_s21 + $0x18] sm:$0xff]  ;;  %v265_v12 = vmul.f32 %v262_v4, %v258_v8  ;;  %p250_p1 = scmp.ge.s32.totalorder %s253_s10, 8  }
  0x2e   : >> { %v267_v13 = vmul.f32 %v262_v4, %v260_v11  ;;  %s478_s30 = sshll.u32 (%p250_p1), %s750_s15, 7  ;;  %s334_s7 = sshll.u32 (%p250_p1), %s909_s9, 4  ;;  %s335_s7 = int_to_ptr.vmem [resolvable:$true] %s334_s7 }
  0x2f   : >> { %v271_v14 = vadd.f32 %v269_v5, %v264_v9  ;;  %v273_v15 = vadd.f32 %v269_v5, %v266_v10  ;;  %v272_v16 = vadd.f32 %v269_v5, %v265_v12  ;;  %s333_s6 = scalar_lea.hbm (%p250_p1), %s965_s3, %s478_s30  ;;  %s319_s24 = scalar_lea.sflag (%p250_p1), [#allocation4], %s894_s19 }
  0x30   : >> { %v274_v17 = vadd.f32 %v269_v5, %v267_v13  ;;  %s336_s8 = sshll.u32 (%p250_p1), %s333_s6, 4  ;;  %s688_s15 = scalar_lea.hbm (%p250_p1), %s965_s3, 256  ;;  %s337_s8 = int_to_ptr.hbm [resolvable:$true] %s336_s8 }
  0x31   : >> { %v275_v18 = vmax.f32 %v271_v14, 0.0  ;;  %v277_v19 = vmax.f32 %v273_v15, 0.0  ;;  %v276_v20 = vmax.f32 %v272_v16, 0.0  ;;  %s682_s27 = sshra.s32 (%p250_p1), %s337_s8, 4  ;;  %s683_s27 = int_to_ptr.hbm [resolvable:$true] %s682_s27 }
  0x32   : >> { %v278_v21 = vmax.f32 %v274_v17, 0.0  ;;  %s684_s26 = scalar_lea.hbm (%p250_p1), %s683_s27, 128  ;;  %p689_p12 = scmp.lt.s32.totalorder (%p250_p1), %s683_s27, %s965_s3 }
  0x33   : >> { %v279_v22 = vadd.f32 %v277_v19, %v275_v18  ;;  %p685_p3 = scmp.ne.s32.totalorder (%p250_p1), %s683_s27, %s684_s26  ;;  %p690_p13 = scmp.lt.s32.totalorder (%p250_p1), %s688_s15, %s684_s26 }
  0x34   : >> { %v280_v23 = vadd.f32 %v278_v21, %v276_v20 }
  0x35   : >> { %468 = vmatmul.msk.f32.vlgmr.msra.gmra.mxu0 %vm283_vm0, %v279_v22  ;;  %p686_p7 = pnand (%p250_p1), %p685_p3, %p871_p2  ;;  %p691_p0 = por (%p250_p1), %p690_p13, %p689_p12 }
  0x36   : >> { %469 = vmatmul.msk.f32.vlgmr.msra.gmra.mxu1 %vm283_vm0, %v280_v23 }
  0x37   : > { %p687_p11 = pneg (%p250_p1), %p686_p7 }
  0x39   : > { %p692_p4 = pnand (%p250_p1), %p691_p0, %p687_p11 }
  0xb0   : > { %252 = sbr.rel (!%p250_p1) target bundleno = 42 (0x2a), region = 95 }
  0xb2   : >> { %v307_v24 = vpop.f32.mrf.mxu0 }
  0xb3   : >> { %316 = vst.msk [vmem:[%s314_s29] sm:$0xff] %vm315_vm1, %v307_v24  ;;  %v310_v25 = vpop.f32.mrf.mxu1 }
  0xb4   : >> { %317 = vst.msk [vmem:[%s314_s29 + $0x8] sm:$0xff] %vm315_vm1, %v310_v25 }
  0xb5   : > { %695 = shalt.err (!%p692_p4)
}
  0xb6   : > { %s770_s19 = smov 128   ;;  %s771_s9 = smov 8  }
  0xb7   : > { %491 = dma.vmem_to_hbm [thread:$0]  (%p871_p2), %s335_s7, 2048, %s337_s8, %s319_s24, %s770_s19, %s770_s19, %s771_s9  }
  0xb8 PF: > { %s351_s25 = sand.u32 1, %s738_s12   ;;  %p505_p6 = pnand %p457_p10, %p839_p5 }
  0xb9   : > { %s352_s29 = scalar_lea.sflag [#allocation4], %s351_s25 }
  0xba   : > { %p506_p8 = pneg %p505_p6 }
  0xbc   : > { %733 = dma.done.wait (%p506_p8), %s352_s29, 2048  }
  0xbd   : > { %735 = vsyncadd (%p506_p8), %s352_s29, 4294965248  ;;  %s20_s17 = sadd.s32 1, %s758_s17   ;;  %s971_s12 = smov %s742_s13 }
  0xbe   : > { %p17_p9 = scmp.ge.s32.totalorder %s20_s17, 4   ;;  %s972_s13 = smov %s746_s14 }
  0xbf   : > { %s973_s14 = smov %s881_s28  ;;  %s974_s15 = smov %s754_s16 }
  0xc0   : > { %s975_s16 = smov %s977_s11  ;;  %19 = sbr.rel (!%p17_p9) target bundleno = 7 (0x7), region = 106 }
  0xc5   :  { %358 = vsyncpa [#allocation3], 1 }
  0xc6   :  { %360 = vsyncpa [#allocation3 + $0x1], 1 }
  0xc7   :  { %361 = vsyncpa [#allocation6], 1 }
  0xc8   :  { %362 = vsyncpa [#allocation4], 1 }
  0xc9   :  { %364 = vsyncpa [#allocation4 + $0x1], 1 }

</bundles_post_ra>
